<compile_context>
chip_gen: v6e
topology: v6e:2x2x1
jax: 0.10.0
libtpu: 0.0.40
codegen_flags: <defaults>
</compile_context>

<pallas_src>
import functools

import numpy as np
import jax
import jax.numpy as jnp
from jax.experimental import pallas as pl
from jax.experimental.pallas import tpu as pltpu

MAX_PAD = 3      # pad once with the largest dilation's padding (d = 3)
NEG_SLOPE = 0.3  # LeakyReLU negative slope


def _sdc_kernel(x_ref, w_ref, b_ref, o_ref, *, B, H, W, Cout, compute_dtype):
    """Whole problem in one grid step.

    x_ref: (B, Hp, Wp*Cin)      padded input, width/channels flattened on lanes
    w_ref: (9, Wp*Cin, W*Cout)  Toeplitz weights, index = dilation_idx*3 + ky
    b_ref: (3, 1, W*Cout)       per-dilation bias tiled along width
    o_ref: (3, B*H, W*Cout)     per-dilation output slabs (lane-dense stores)
    """
    K = x_ref.shape[2]   # Wp * Cin
    M = B * H
    for di in range(3):          # dilation index -> dilation d = di + 1
        d = di + 1
        off = MAX_PAD - d
        acc = jnp.zeros((M, W * Cout), dtype=jnp.float32)
        for ky in range(3):
            oh = off + ky * d
            # Sublane-only row-band slice (no lane shifts), batch merged into M.
            band = x_ref[:, oh:oh + H, :].reshape(M, K).astype(compute_dtype)
            acc = acc + jnp.dot(band, w_ref[di * 3 + ky],
                                preferred_element_type=jnp.float32)
        acc = acc + b_ref[di]                       # (1, W*Cout) broadcast
        acc = jnp.where(acc >= 0, acc, NEG_SLOPE * acc)   # LeakyReLU(0.3) in f32
        o_ref[di] = acc                             # single 128-lane-wide store


def _build_row_weights(w_hwio_list, W, compute_dtype):
    """Fold (kx, Cin) into the contraction and (width, Cout) into output lanes.

    Returns (9, Wp*Cin, W*Cout), index = dilation_idx*3 + ky, with
      mat[wcol*Cin + ci, wout*Cout + co] = w[ky, kx, ci, co]
        where wcol = wout + (MAX_PAD - d) + kx*d  (in MAX_PAD-padded coords).
    """
    Wp = W + 2 * MAX_PAD
    mats = []
    for di, w in enumerate(w_hwio_list):            # w: (3, 3, Cin, Cout)
        d = di + 1
        off = MAX_PAD - d
        Cin, Cout = w.shape[2], w.shape[3]
        # Static 0/1 selector S[kx, wcol, wout] = 1 iff wcol == wout + off + kx*d.
        S = np.zeros((3, Wp, W), dtype=np.float32)
        for kx in range(3):
            for wout in range(W):
                S[kx, wout + off + kx * d, wout] = 1.0
        S = jnp.asarray(S)
        for ky in range(3):
            mat = jnp.einsum('kpw,kio->piwo', S, w[ky])   # (Wp, Cin, W, Cout)
            mats.append(mat.reshape(Wp * Cin, W * Cout))
    return jnp.stack(mats, axis=0).astype(compute_dtype)


@functools.partial(jax.jit, static_argnames=("compute_dtype",))
def sdc_forward(x_nhwc, w_hwio_list, b_list, compute_dtype=jnp.float32):
    """x_nhwc: (B, H, W, Cin) f32
    w_hwio_list: 3 conv weights in HWIO layout, each (3, 3, Cin, Cout)
    b_list:      3 biases, each (Cout,)
    compute_dtype: MXU operand dtype (jnp.bfloat16 recommended on v6e/v7x;
                   accumulation, bias and LeakyReLU stay f32).
    returns: (B, H, W, 3*Cout) f32  -- concat([d=1, d=2, d=3]) on channels.
    """
    B, H, W, Cin = x_nhwc.shape
    Cout = w_hwio_list[0].shape[-1]
    Hp, Wp = H + 2 * MAX_PAD, W + 2 * MAX_PAD

    # Wrapper-side layout plumbing. The explicit pad is fine at small H/W; for
    # large inputs, fold the halo into an H-strip grid instead of materializing it.
    x_pad = jnp.pad(
        x_nhwc, ((0, 0), (MAX_PAD, MAX_PAD), (MAX_PAD, MAX_PAD), (0, 0)))
    x_rows = x_pad.reshape(B, Hp, Wp * Cin)

    w_rows = _build_row_weights(w_hwio_list, W, compute_dtype)        # (9, Wp*Cin, W*Cout)
    b_rows = jnp.stack([jnp.tile(b, W) for b in b_list])[:, None, :]  # (3, 1, W*Cout)
    b_rows = b_rows.astype(jnp.float32)

    kernel = functools.partial(_sdc_kernel, B=B, H=H, W=W, Cout=Cout,
                               compute_dtype=compute_dtype)

    out_raw = pl.pallas_call(
        kernel,
        out_shape=jax.ShapeDtypeStruct((3, B * H, W * Cout), jnp.float32),
        grid_spec=pltpu.PrefetchScalarGridSpec(
            num_scalar_prefetch=0,
            grid=(1,),
            in_specs=[
                pl.BlockSpec((B, Hp, Wp * Cin), lambda i: (0, 0, 0)),
                pl.BlockSpec((9, Wp * Cin, W * Cout), lambda i: (0, 0, 0)),
                pl.BlockSpec((3, 1, W * Cout), lambda i: (0, 0, 0)),
            ],
            out_specs=pl.BlockSpec((3, B * H, W * Cout), lambda i: (0, 0, 0)),
        ),
        compiler_params=pltpu.CompilerParams(
            dimension_semantics=("arbitrary",)),
    )(x_rows, w_rows, b_rows)

    # (3, B*H, W*Cout) -> (B, H, W, 3*Cout): wrapper-side reshape/transpose only.
    out = out_raw.reshape(3, B, H, W, Cout).transpose(1, 2, 3, 0, 4)
    return out.reshape(B, H, W, 3 * Cout)


def _reference_sdc(x_nhwc, w_hwio_list, b_list):
    """Pure-JAX reference using lax.conv_general_dilated (NHWC / HWIO)."""
    outs = []
    for d, (w, b) in enumerate(zip(w_hwio_list, b_list), start=1):
        y = jax.lax.conv_general_dilated(
            x_nhwc, w,
            window_strides=(1, 1),
            padding=((d, d), (d, d)),
            rhs_dilation=(d, d),
            dimension_numbers=("NHWC", "HWIO", "NHWC"),
        ) + b[None, None, None, :]
        outs.append(jnp.where(y >= 0, y, NEG_SLOPE * y))
    return jnp.concatenate(outs, axis=-1)


if __name__ == "__main__":
    # Small shapes consistent with the module: nChannels=4, nFeatures=8.
    B, Cin, H, W = 2, 4, 16, 16
    Cout = 8

    key = jax.random.PRNGKey(0)
    kx_in, *kws = jax.random.split(key, 1 + 6)

    # Input in PyTorch NCHW, converted to NHWC for the kernel.
    x_nchw = jax.random.normal(kx_in, (B, Cin, H, W), dtype=jnp.float32)
    x_nhwc = jnp.transpose(x_nchw, (0, 2, 3, 1))

    # Deterministic parameter init (PyTorch conv weight shape: (Cout, Cin, 3, 3)).
    w_hwio_list, b_list = [], []
    for i in range(3):
        w_oihw = 0.1 * jax.random.normal(kws[2 * i], (Cout, Cin, 3, 3),
                                         dtype=jnp.float32)
        b = 0.1 * jax.random.normal(kws[2 * i + 1], (Cout,), dtype=jnp.float32)
        w_hwio_list.append(jnp.transpose(w_oihw, (2, 3, 1, 0)))  # HWIO
        b_list.append(b)

    ref = _reference_sdc(x_nhwc, w_hwio_list, b_list)

    # f32 MXU-operand path (exact match vs. reference).
    out = sdc_forward(x_nhwc, w_hwio_list, b_list)
    out = jax.block_until_ready(out)
    assert out.shape == (B, H, W, 3 * Cout), out.shape
    assert jnp.allclose(out, ref, atol=1e-4, rtol=1e-4), (
        float(jnp.max(jnp.abs(out - ref))))

    # bf16 MXU-operand path (v6e/v7x); f32 accumulation -> loose tolerance only.
    out_bf16 = sdc_forward(x_nhwc, w_hwio_list, b_list,
                           compute_dtype=jnp.bfloat16)
    out_bf16 = jax.block_until_ready(out_bf16)
    assert jnp.allclose(out_bf16, ref, atol=5e-2, rtol=5e-2), (
        float(jnp.max(jnp.abs(out_bf16 - ref))))

    # NCHW view (matches torch output layout) if a consumer needs it:
    _ = jnp.transpose(out, (0, 3, 1, 2))

    print("KERNEL_OK")
</pallas_src>

<mosaic_0001>
module attributes {stable_mosaic.version = 11 : i64} {
  func.func @_sdc_kernel(%arg0: i32, %arg1: memref<2x22x88xf32, #tpu.memory_space<vmem>>, %arg2: memref<9x88x128xf32, #tpu.memory_space<vmem>>, %arg3: memref<3x1x128xf32, #tpu.memory_space<vmem>>, %arg4: memref<3x32x128xf32, #tpu.memory_space<vmem>>) attributes {dimension_semantics = [#tpu.dimension_semantics<arbitrary>], iteration_bounds = array<i64: 1>, scalar_prefetch = 0 : i64, scratch_operands = 0 : i64, tpu.core_type = #tpu.core_type<tc>, window_params = [{pipeline_mode = #tpu.pipeline_mode<synchronous>, transform_indices = @transform_0, window_bounds = array<i64: 2, 22, 88>}, {pipeline_mode = #tpu.pipeline_mode<synchronous>, transform_indices = @transform_1, window_bounds = array<i64: 9, 88, 128>}, {pipeline_mode = #tpu.pipeline_mode<synchronous>, transform_indices = @transform_2, window_bounds = array<i64: 3, 1, 128>}, {pipeline_mode = #tpu.pipeline_mode<synchronous>, transform_indices = @transform_3, window_bounds = array<i64: 3, 32, 128>}]} {
    %cst = arith.constant 0.000000e+00 : f32
    %0 = vector.broadcast %cst : f32 to vector<32x128xf32>
    %c0 = arith.constant 0 : index
    %c2 = arith.constant 2 : index
    %c0_0 = arith.constant 0 : index
    %1 = vector.load %arg1[%c0, %c2, %c0_0] : memref<2x22x88xf32, #tpu.memory_space<vmem>>, vector<2x16x88xf32>
    %2 = vector.shape_cast %1 : vector<2x16x88xf32> to vector<32x88xf32>
    %c0_1 = arith.constant 0 : index
    %c0_2 = arith.constant 0 : index
    %c0_3 = arith.constant 0 : index
    %3 = vector.load %arg2[%c0_1, %c0_2, %c0_3] : memref<9x88x128xf32, #tpu.memory_space<vmem>>, vector<1x88x128xf32>
    %4 = vector.shape_cast %3 : vector<1x88x128xf32> to vector<88x128xf32>
    %cst_4 = arith.constant dense<0.000000e+00> : vector<32x128xf32>
    %5 = tpu.matmul %2, %4, %cst_4 {dimension_numbers = #tpu.dot_dimension_numbers<[1], [0], [0], [1], [0, 0, 1, 1], [], []>} : vector<32x88xf32>, vector<88x128xf32>, vector<32x128xf32> -> vector<32x128xf32>
    %6 = arith.addf %0, %5 : vector<32x128xf32>
    %c0_5 = arith.constant 0 : index
    %c3 = arith.constant 3 : index
    %c0_6 = arith.constant 0 : index
    %7 = vector.load %arg1[%c0_5, %c3, %c0_6] : memref<2x22x88xf32, #tpu.memory_space<vmem>>, vector<2x16x88xf32>
    %8 = vector.shape_cast %7 : vector<2x16x88xf32> to vector<32x88xf32>
    %c1 = arith.constant 1 : index
    %c0_7 = arith.constant 0 : index
    %c0_8 = arith.constant 0 : index
    %9 = vector.load %arg2[%c1, %c0_7, %c0_8] : memref<9x88x128xf32, #tpu.memory_space<vmem>>, vector<1x88x128xf32>
    %10 = vector.shape_cast %9 : vector<1x88x128xf32> to vector<88x128xf32>
    %cst_9 = arith.constant dense<0.000000e+00> : vector<32x128xf32>
    %11 = tpu.matmul %8, %10, %cst_9 {dimension_numbers = #tpu.dot_dimension_numbers<[1], [0], [0], [1], [0, 0, 1, 1], [], []>} : vector<32x88xf32>, vector<88x128xf32>, vector<32x128xf32> -> vector<32x128xf32>
    %12 = arith.addf %6, %11 : vector<32x128xf32>
    %c0_10 = arith.constant 0 : index
    %c4 = arith.constant 4 : index
    %c0_11 = arith.constant 0 : index
    %13 = vector.load %arg1[%c0_10, %c4, %c0_11] : memref<2x22x88xf32, #tpu.memory_space<vmem>>, vector<2x16x88xf32>
    %14 = vector.shape_cast %13 : vector<2x16x88xf32> to vector<32x88xf32>
    %c2_12 = arith.constant 2 : index
    %c0_13 = arith.constant 0 : index
    %c0_14 = arith.constant 0 : index
    %15 = vector.load %arg2[%c2_12, %c0_13, %c0_14] : memref<9x88x128xf32, #tpu.memory_space<vmem>>, vector<1x88x128xf32>
    %16 = vector.shape_cast %15 : vector<1x88x128xf32> to vector<88x128xf32>
    %cst_15 = arith.constant dense<0.000000e+00> : vector<32x128xf32>
    %17 = tpu.matmul %14, %16, %cst_15 {dimension_numbers = #tpu.dot_dimension_numbers<[1], [0], [0], [1], [0, 0, 1, 1], [], []>} : vector<32x88xf32>, vector<88x128xf32>, vector<32x128xf32> -> vector<32x128xf32>
    %18 = arith.addf %12, %17 : vector<32x128xf32>
    %c0_16 = arith.constant 0 : index
    %c0_17 = arith.constant 0 : index
    %c0_18 = arith.constant 0 : index
    %19 = vector.load %arg3[%c0_16, %c0_17, %c0_18] : memref<3x1x128xf32, #tpu.memory_space<vmem>>, vector<1x1x128xf32>
    %20 = vector.shape_cast %19 : vector<1x1x128xf32> to vector<1x128xf32>
    %21 = vector.broadcast %20 : vector<1x128xf32> to vector<32x128xf32>
    %22 = arith.addf %18, %21 : vector<32x128xf32>
    %cst_19 = arith.constant 0.000000e+00 : f32
    %23 = vector.broadcast %cst_19 : f32 to vector<32x128xf32>
    %24 = arith.cmpf oge, %22, %23 : vector<32x128xf32>
    %cst_20 = arith.constant 3.000000e-01 : f32
    %25 = vector.broadcast %cst_20 : f32 to vector<32x128xf32>
    %26 = arith.mulf %25, %22 : vector<32x128xf32>
    %27 = arith.select %24, %22, %26 : vector<32x128xi1>, vector<32x128xf32>
    %c0_21 = arith.constant 0 : index
    %c0_22 = arith.constant 0 : index
    %c0_23 = arith.constant 0 : index
    %28 = vector.load %arg4[%c0_21, %c0_22, %c0_23] : memref<3x32x128xf32, #tpu.memory_space<vmem>>, vector<1x32x128xf32>
    %29 = vector.shape_cast %28 : vector<1x32x128xf32> to vector<32x128xf32>
    %30 = vector.shape_cast %27 : vector<32x128xf32> to vector<1x32x128xf32>
    tpu.vector_store %arg4[%c0_21, %c0_22, %c0_23], %30 {strides = array<i32>} : memref<3x32x128xf32, #tpu.memory_space<vmem>>, vector<1x32x128xf32>,
    %cst_24 = arith.constant 0.000000e+00 : f32
    %31 = vector.broadcast %cst_24 : f32 to vector<32x128xf32>
    %c0_25 = arith.constant 0 : index
    %c1_26 = arith.constant 1 : index
    %c0_27 = arith.constant 0 : index
    %32 = vector.load %arg1[%c0_25, %c1_26, %c0_27] : memref<2x22x88xf32, #tpu.memory_space<vmem>>, vector<2x16x88xf32>
    %33 = vector.shape_cast %32 : vector<2x16x88xf32> to vector<32x88xf32>
    %c3_28 = arith.constant 3 : index
    %c0_29 = arith.constant 0 : index
    %c0_30 = arith.constant 0 : index
    %34 = vector.load %arg2[%c3_28, %c0_29, %c0_30] : memref<9x88x128xf32, #tpu.memory_space<vmem>>, vector<1x88x128xf32>
    %35 = vector.shape_cast %34 : vector<1x88x128xf32> to vector<88x128xf32>
    %cst_31 = arith.constant dense<0.000000e+00> : vector<32x128xf32>
    %36 = tpu.matmul %33, %35, %cst_31 {dimension_numbers = #tpu.dot_dimension_numbers<[1], [0], [0], [1], [0, 0, 1, 1], [], []>} : vector<32x88xf32>, vector<88x128xf32>, vector<32x128xf32> -> vector<32x128xf32>
    %37 = arith.addf %31, %36 : vector<32x128xf32>
    %c0_32 = arith.constant 0 : index
    %c3_33 = arith.constant 3 : index
    %c0_34 = arith.constant 0 : index
    %38 = vector.load %arg1[%c0_32, %c3_33, %c0_34] : memref<2x22x88xf32, #tpu.memory_space<vmem>>, vector<2x16x88xf32>
    %39 = vector.shape_cast %38 : vector<2x16x88xf32> to vector<32x88xf32>
    %c4_35 = arith.constant 4 : index
    %c0_36 = arith.constant 0 : index
    %c0_37 = arith.constant 0 : index
    %40 = vector.load %arg2[%c4_35, %c0_36, %c0_37] : memref<9x88x128xf32, #tpu.memory_space<vmem>>, vector<1x88x128xf32>
    %41 = vector.shape_cast %40 : vector<1x88x128xf32> to vector<88x128xf32>
    %cst_38 = arith.constant dense<0.000000e+00> : vector<32x128xf32>
    %42 = tpu.matmul %39, %41, %cst_38 {dimension_numbers = #tpu.dot_dimension_numbers<[1], [0], [0], [1], [0, 0, 1, 1], [], []>} : vector<32x88xf32>, vector<88x128xf32>, vector<32x128xf32> -> vector<32x128xf32>
    %43 = arith.addf %37, %42 : vector<32x128xf32>
    %c0_39 = arith.constant 0 : index
    %c5 = arith.constant 5 : index
    %c0_40 = arith.constant 0 : index
    %44 = vector.load %arg1[%c0_39, %c5, %c0_40] : memref<2x22x88xf32, #tpu.memory_space<vmem>>, vector<2x16x88xf32>
    %45 = vector.shape_cast %44 : vector<2x16x88xf32> to vector<32x88xf32>
    %c5_41 = arith.constant 5 : index
    %c0_42 = arith.constant 0 : index
    %c0_43 = arith.constant 0 : index
    %46 = vector.load %arg2[%c5_41, %c0_42, %c0_43] : memref<9x88x128xf32, #tpu.memory_space<vmem>>, vector<1x88x128xf32>
    %47 = vector.shape_cast %46 : vector<1x88x128xf32> to vector<88x128xf32>
    %cst_44 = arith.constant dense<0.000000e+00> : vector<32x128xf32>
    %48 = tpu.matmul %45, %47, %cst_44 {dimension_numbers = #tpu.dot_dimension_numbers<[1], [0], [0], [1], [0, 0, 1, 1], [], []>} : vector<32x88xf32>, vector<88x128xf32>, vector<32x128xf32> -> vector<32x128xf32>
    %49 = arith.addf %43, %48 : vector<32x128xf32>
    %c1_45 = arith.constant 1 : index
    %c0_46 = arith.constant 0 : index
    %c0_47 = arith.constant 0 : index
    %50 = vector.load %arg3[%c1_45, %c0_46, %c0_47] : memref<3x1x128xf32, #tpu.memory_space<vmem>>, vector<1x1x128xf32>
    %51 = vector.shape_cast %50 : vector<1x1x128xf32> to vector<1x128xf32>
    %52 = vector.broadcast %51 : vector<1x128xf32> to vector<32x128xf32>
    %53 = arith.addf %49, %52 : vector<32x128xf32>
    %cst_48 = arith.constant 0.000000e+00 : f32
    %54 = vector.broadcast %cst_48 : f32 to vector<32x128xf32>
    %55 = arith.cmpf oge, %53, %54 : vector<32x128xf32>
    %cst_49 = arith.constant 3.000000e-01 : f32
    %56 = vector.broadcast %cst_49 : f32 to vector<32x128xf32>
    %57 = arith.mulf %56, %53 : vector<32x128xf32>
    %58 = arith.select %55, %53, %57 : vector<32x128xi1>, vector<32x128xf32>
    %c1_50 = arith.constant 1 : index
    %c0_51 = arith.constant 0 : index
    %c0_52 = arith.constant 0 : index
    %59 = vector.load %arg4[%c1_50, %c0_51, %c0_52] : memref<3x32x128xf32, #tpu.memory_space<vmem>>, vector<1x32x128xf32>
    %60 = vector.shape_cast %59 : vector<1x32x128xf32> to vector<32x128xf32>
    %61 = vector.shape_cast %58 : vector<32x128xf32> to vector<1x32x128xf32>
    tpu.vector_store %arg4[%c1_50, %c0_51, %c0_52], %61 {strides = array<i32>} : memref<3x32x128xf32, #tpu.memory_space<vmem>>, vector<1x32x128xf32>,
    %cst_53 = arith.constant 0.000000e+00 : f32
    %62 = vector.broadcast %cst_53 : f32 to vector<32x128xf32>
    %c0_54 = arith.constant 0 : index
    %c0_55 = arith.constant 0 : index
    %c0_56 = arith.constant 0 : index
    %63 = vector.load %arg1[%c0_54, %c0_55, %c0_56] : memref<2x22x88xf32, #tpu.memory_space<vmem>>, vector<2x16x88xf32>
    %64 = vector.shape_cast %63 : vector<2x16x88xf32> to vector<32x88xf32>
    %c6 = arith.constant 6 : index
    %c0_57 = arith.constant 0 : index
    %c0_58 = arith.constant 0 : index
    %65 = vector.load %arg2[%c6, %c0_57, %c0_58] : memref<9x88x128xf32, #tpu.memory_space<vmem>>, vector<1x88x128xf32>
    %66 = vector.shape_cast %65 : vector<1x88x128xf32> to vector<88x128xf32>
    %cst_59 = arith.constant dense<0.000000e+00> : vector<32x128xf32>
    %67 = tpu.matmul %64, %66, %cst_59 {dimension_numbers = #tpu.dot_dimension_numbers<[1], [0], [0], [1], [0, 0, 1, 1], [], []>} : vector<32x88xf32>, vector<88x128xf32>, vector<32x128xf32> -> vector<32x128xf32>
    %68 = arith.addf %62, %67 : vector<32x128xf32>
    %c0_60 = arith.constant 0 : index
    %c3_61 = arith.constant 3 : index
    %c0_62 = arith.constant 0 : index
    %69 = vector.load %arg1[%c0_60, %c3_61, %c0_62] : memref<2x22x88xf32, #tpu.memory_space<vmem>>, vector<2x16x88xf32>
    %70 = vector.shape_cast %69 : vector<2x16x88xf32> to vector<32x88xf32>
    %c7 = arith.constant 7 : index
    %c0_63 = arith.constant 0 : index
    %c0_64 = arith.constant 0 : index
    %71 = vector.load %arg2[%c7, %c0_63, %c0_64] : memref<9x88x128xf32, #tpu.memory_space<vmem>>, vector<1x88x128xf32>
    %72 = vector.shape_cast %71 : vector<1x88x128xf32> to vector<88x128xf32>
    %cst_65 = arith.constant dense<0.000000e+00> : vector<32x128xf32>
    %73 = tpu.matmul %70, %72, %cst_65 {dimension_numbers = #tpu.dot_dimension_numbers<[1], [0], [0], [1], [0, 0, 1, 1], [], []>} : vector<32x88xf32>, vector<88x128xf32>, vector<32x128xf32> -> vector<32x128xf32>
    %74 = arith.addf %68, %73 : vector<32x128xf32>
    %c0_66 = arith.constant 0 : index
    %c6_67 = arith.constant 6 : index
    %c0_68 = arith.constant 0 : index
    %75 = vector.load %arg1[%c0_66, %c6_67, %c0_68] : memref<2x22x88xf32, #tpu.memory_space<vmem>>, vector<2x16x88xf32>
    %76 = vector.shape_cast %75 : vector<2x16x88xf32> to vector<32x88xf32>
    %c8 = arith.constant 8 : index
    %c0_69 = arith.constant 0 : index
    %c0_70 = arith.constant 0 : index
    %77 = vector.load %arg2[%c8, %c0_69, %c0_70] : memref<9x88x128xf32, #tpu.memory_space<vmem>>, vector<1x88x128xf32>
    %78 = vector.shape_cast %77 : vector<1x88x128xf32> to vector<88x128xf32>
    %cst_71 = arith.constant dense<0.000000e+00> : vector<32x128xf32>
    %79 = tpu.matmul %76, %78, %cst_71 {dimension_numbers = #tpu.dot_dimension_numbers<[1], [0], [0], [1], [0, 0, 1, 1], [], []>} : vector<32x88xf32>, vector<88x128xf32>, vector<32x128xf32> -> vector<32x128xf32>
    %80 = arith.addf %74, %79 : vector<32x128xf32>
    %c2_72 = arith.constant 2 : index
    %c0_73 = arith.constant 0 : index
    %c0_74 = arith.constant 0 : index
    %81 = vector.load %arg3[%c2_72, %c0_73, %c0_74] : memref<3x1x128xf32, #tpu.memory_space<vmem>>, vector<1x1x128xf32>
    %82 = vector.shape_cast %81 : vector<1x1x128xf32> to vector<1x128xf32>
    %83 = vector.broadcast %82 : vector<1x128xf32> to vector<32x128xf32>
    %84 = arith.addf %80, %83 : vector<32x128xf32>
    %cst_75 = arith.constant 0.000000e+00 : f32
    %85 = vector.broadcast %cst_75 : f32 to vector<32x128xf32>
    %86 = arith.cmpf oge, %84, %85 : vector<32x128xf32>
    %cst_76 = arith.constant 3.000000e-01 : f32
    %87 = vector.broadcast %cst_76 : f32 to vector<32x128xf32>
    %88 = arith.mulf %87, %84 : vector<32x128xf32>
    %89 = arith.select %86, %84, %88 : vector<32x128xi1>, vector<32x128xf32>
    %c2_77 = arith.constant 2 : index
    %c0_78 = arith.constant 0 : index
    %c0_79 = arith.constant 0 : index
    %90 = vector.load %arg4[%c2_77, %c0_78, %c0_79] : memref<3x32x128xf32, #tpu.memory_space<vmem>>, vector<1x32x128xf32>
    %91 = vector.shape_cast %90 : vector<1x32x128xf32> to vector<32x128xf32>
    %92 = vector.shape_cast %89 : vector<32x128xf32> to vector<1x32x128xf32>
    tpu.vector_store %arg4[%c2_77, %c0_78, %c0_79], %92 {strides = array<i32>} : memref<3x32x128xf32, #tpu.memory_space<vmem>>, vector<1x32x128xf32>,
    return
  }
  func.func @transform_0(%arg0: i32) -> (i32, i32, i32) {
    %c0_i32 = arith.constant 0 : i32
    %c0_i32_0 = arith.constant 0 : i32
    %c0_i32_1 = arith.constant 0 : i32
    %c0_i32_2 = arith.constant 0 : i32
    return %c0_i32, %c0_i32_0, %c0_i32_1 : i32, i32, i32
  }
  func.func @transform_1(%arg0: i32) -> (i32, i32, i32) {
    %c0_i32 = arith.constant 0 : i32
    %c0_i32_0 = arith.constant 0 : i32
    %c0_i32_1 = arith.constant 0 : i32
    %c0_i32_2 = arith.constant 0 : i32
    return %c0_i32, %c0_i32_0, %c0_i32_1 : i32, i32, i32
  }
  func.func @transform_2(%arg0: i32) -> (i32, i32, i32) {
    %c0_i32 = arith.constant 0 : i32
    %c0_i32_0 = arith.constant 0 : i32
    %c0_i32_1 = arith.constant 0 : i32
    %c0_i32_2 = arith.constant 0 : i32
    return %c0_i32, %c0_i32_0, %c0_i32_1 : i32, i32, i32
  }
  func.func @transform_3(%arg0: i32) -> (i32, i32, i32) {
    %c0_i32 = arith.constant 0 : i32
    %c0_i32_0 = arith.constant 0 : i32
    %c0_i32_1 = arith.constant 0 : i32
    %c0_i32_2 = arith.constant 0 : i32
    return %c0_i32, %c0_i32_0, %c0_i32_1 : i32, i32, i32
  }
}

</mosaic_0001>

<bundles_post_ra>
// kernel: tile.18
= control target key start
LH: loop header
LB: loop body
LE: loop exit
PB: predicated region body
PF: predicated region fallthrough
CT: control target
= control target key end

     0   :  { %s28_s0 = inlined_call_operand.vmem [shape: f32[8], index: 0, kind: input, shape index: {}]   ;;  %s29_s1 = inlined_call_operand.vmem [shape: f32[16,8], index: 1, kind: output, shape index: {}]  }
   0x1   :  { %v4_v0 = vld [vmem:[%s28_s0] ss:$0 sm:$0xff] }
   0x2   :  { %5 = vst [vmem:[%s29_s1] sm:$0xff] %v4_v0  ;;  %8 = vst [vmem:[%s29_s1 + $0x8] sm:$0xff] %v4_v0 }

// kernel: tile.27
= control target key start
LH: loop header
LB: loop body
LE: loop exit
PB: predicated region body
PF: predicated region fallthrough
CT: control target
= control target key end

     0   :  { %s133_s10 = smov 120   ;;  %s134_s11 = smov 104   ;;  %vm3_vm0 = vcmask 64512   ;;  %vm9_vm1 = vcmask 1048512   ;;  %vm15_vm2 = vcmask 982912   ;;  %vm21_vm3 = vcmask 917312   ;;  %s209_s0 = inlined_call_operand.vmem [shape: f32[16,8], index: 0, kind: input, shape index: {}]   ;;  %s210_s1 = inlined_call_operand.vmem [shape: f32[1,128], index: 1, kind: output, shape index: {}]  }
   0x1   :  { %v103_v0 = vld [vmem:[%s209_s0 + $0xf] sm:$0x1]   ;;  %v105_v1 = vld [vmem:[%s209_s0 + $0xd] sm:$0x1]   ;;  %v104_v2 = vld [vmem:[%s209_s0 + $0xe] sm:$0x1]  }
   0x2   :  { %7 = vrot.lane.b32.xlu0 %v103_v0, %s133_s10  ;;  %19 = vrot.lane.b32.xlu1 %v105_v1, %s134_s11  ;;  %v106_v3 = vld [vmem:[%s209_s0 + $0xc] sm:$0x1]   ;;  %s135_s16 = smov 112   ;;  %s136_s17 = smov 96   ;;  %v107_v4 = vld [vmem:[%s209_s0 + $0xb] sm:$0x1]  }
   0x3   :  { %v108_v5 = vld [vmem:[%s209_s0 + $0xa] sm:$0x1]   ;;  %v2_v6 = vld [vmem:[%s209_s0] sm:$0x1]   ;;  %s137_s24 = smov 88   ;;  %s138_s25 = smov 80  }
   0x4   :  { %4 = vst.msk [vmem:[#allocation0] sm:$0x1] %vm3_vm0, %v2_v6   ;;  %v109_v7 = vld [vmem:[%s209_s0 + $0x9] sm:$0x1]   ;;  %v110_v8 = vld [vmem:[%s209_s0 + $0x8] sm:$0x1]  }
   0x5   :  { %s139_s30 = smov 72   ;;  %s140_s2 = smov 64   ;;  %v111_v9 = vld [vmem:[%s209_s0 + $0x7] sm:$0x1]   ;;  %v112_v10 = vld [vmem:[%s209_s0 + $0x6] sm:$0x1]  }
   0x6   :  { %13 = vrot.lane.b32.xlu0 %v104_v2, %s135_s16  ;;  %25 = vrot.lane.b32.xlu1 %v106_v3, %s136_s17  ;;  %s141_s7 = smov 56   ;;  %s142_s8 = smov 48   ;;  %v113_v11 = vld [vmem:[%s209_s0 + $0x5] sm:$0x1]   ;;  %v114_v12 = vld [vmem:[%s209_s0 + $0x4] sm:$0x1]  }
   0x7   :  { %s143_s13 = smov 40   ;;  %s144_s14 = smov 32   ;;  %v115_v13 = vld [vmem:[%s209_s0 + $0x3] sm:$0x1]   ;;  %v116_v14 = vld [vmem:[%s209_s0 + $0x2] sm:$0x1]  }
   0x8   :  { %s145_s19 = smov 24   ;;  %s146_s20 = smov 16   ;;  %v117_v15 = vld [vmem:[%s209_s0 + $0x1] sm:$0x1]   ;;  %vm27_vm4 = vcmask 851712   ;;  %vm33_vm5 = vcmask 786112  }
   0x9   :  { %s147_s0 = smov 8   ;;  %vm39_vm6 = vcmask 720512   ;;  %vm45_vm7 = vcmask 654912   ;;  %vm51_vm8 = vcmask 589312   ;;  %vm57_vm9 = vcmask 523712  }
   0xa   :  { %31 = vrot.lane.b32.xlu0 %v107_v4, %s137_s24  ;;  %37 = vrot.lane.b32.xlu1 %v108_v5, %s138_s25  ;;  %vm63_vm10 = vcmask 458112   ;;  %vm69_vm11 = vcmask 392512   ;;  %vm75_vm12 = vcmask 326912   ;;  %vm81_vm13 = vcmask 261312  }
   0xb   :  { %vm87_vm14 = vcmask 195712   ;;  %vm93_vm15 = vcmask 130112  }
   0xe   :  { %43 = vrot.lane.b32.xlu0 %v109_v7, %s139_s30  ;;  %49 = vrot.lane.b32.xlu1 %v110_v8, %s140_s2 }
  0x12   :  { %55 = vrot.lane.b32.xlu0 %v111_v9, %s141_s7  ;;  %61 = vrot.lane.b32.xlu1 %v112_v10, %s142_s8 }
  0x16   :  { %67 = vrot.lane.b32.xlu0 %v113_v11, %s143_s13  ;;  %73 = vrot.lane.b32.xlu1 %v114_v12, %s144_s14 }
  0x1a   :  { %79 = vrot.lane.b32.xlu0 %v115_v13, %s145_s19  ;;  %85 = vrot.lane.b32.xlu1 %v116_v14, %s146_s20 }
  0x1e   :  { %91 = vrot.lane.b32.xlu0 %v117_v15, %s147_s0 }
  0x74   :  { %v8_v16 = vpop.permute.xlu0 %7   ;;  %v20_v17 = vpop.permute.xlu1 %19  }
  0x75   :  { %10 = vst.msk [vmem:[#allocation0] sm:$0x1] %vm9_vm1, %v8_v16  }
  0x78   :  { %v14_v18 = vpop.permute.xlu0 %13   ;;  %v26_v19 = vpop.permute.xlu1 %25  }
  0x79   :  { %16 = vst.msk [vmem:[#allocation0] sm:$0x1] %vm15_vm2, %v14_v18  }
  0x7a   :  { %22 = vst.msk [vmem:[#allocation0] sm:$0x1] %vm21_vm3, %v20_v17  }
  0x7b   :  { %28 = vst.msk [vmem:[#allocation0] sm:$0x1] %vm27_vm4, %v26_v19  }
  0x7c   :  { %v32_v20 = vpop.permute.xlu0 %31   ;;  %v38_v21 = vpop.permute.xlu1 %37  }
  0x7d   :  { %34 = vst.msk [vmem:[#allocation0] sm:$0x1] %vm33_vm5, %v32_v20  }
  0x7e   :  { %40 = vst.msk [vmem:[#allocation0] sm:$0x1] %vm39_vm6, %v38_v21  }
  0x80   :  { %v44_v22 = vpop.permute.xlu0 %43   ;;  %v50_v23 = vpop.permute.xlu1 %49  }
  0x81   :  { %46 = vst.msk [vmem:[#allocation0] sm:$0x1] %vm45_vm7, %v44_v22  }
  0x82   :  { %52 = vst.msk [vmem:[#allocation0] sm:$0x1] %vm51_vm8, %v50_v23  }
  0x84   :  { %v56_v24 = vpop.permute.xlu0 %55   ;;  %v62_v25 = vpop.permute.xlu1 %61  }
  0x85   :  { %58 = vst.msk [vmem:[#allocation0] sm:$0x1] %vm57_vm9, %v56_v24  }
  0x86   :  { %64 = vst.msk [vmem:[#allocation0] sm:$0x1] %vm63_vm10, %v62_v25  }
  0x88   :  { %v68_v26 = vpop.permute.xlu0 %67   ;;  %v74_v27 = vpop.permute.xlu1 %73  }
  0x89   :  { %70 = vst.msk [vmem:[#allocation0] sm:$0x1] %vm69_vm11, %v68_v26  }
  0x8a   :  { %76 = vst.msk [vmem:[#allocation0] sm:$0x1] %vm75_vm12, %v74_v27  }
  0x8c   :  { %v80_v28 = vpop.permute.xlu0 %79   ;;  %v86_v29 = vpop.permute.xlu1 %85  }
  0x8d   :  { %82 = vst.msk [vmem:[#allocation0] sm:$0x1] %vm81_vm13, %v80_v28  }
  0x8e   :  { %88 = vst.msk [vmem:[#allocation0] sm:$0x1] %vm87_vm14, %v86_v29  }
  0x90   :  { %v92_v30 = vpop.permute.xlu0 %91  }
  0x91   :  { %94 = vst.msk [vmem:[#allocation0] sm:$0x1] %vm93_vm15, %v92_v30  }
  0x98   :  { %v99_v31 = vld [vmem:[#allocation0] sm:$0x1] }
  0x99   :  { %102 = vst [vmem:[%s210_s1] sm:$0x1] %v99_v31 }

// kernel: sdc_forward.1
= control target key start
LH: loop header
LB: loop body
LE: loop exit
PB: predicated region body
PF: predicated region fallthrough
CT: control target
= control target key end

     0   :  { %vm45_vm0 = vcmask 719872   ;;  %s2180_s1 = inlined_call_operand.vmem [shape: f32[9,88,128], index: 1, kind: input, shape index: {}]   ;;  %s2181_s0 = inlined_call_operand.vmem [shape: f32[2,22,88], index: 0, kind: input, shape index: {}]   ;;  %s2182_s2 = inlined_call_operand.vmem [shape: f32[3,1,128], index: 2, kind: input, shape index: {}]   ;;  %s2183_s3 = inlined_call_operand.vmem [shape: f32[3,32,128], index: 3, kind: output, shape index: {}]  }
   0x1   :  { %v1142_v0 = vld [vmem:[%s2180_s1 + $0xa8] sm:$0xff]  ;;  %v28_v1 = vld [vmem:[%s2180_s1 + $0x50] sm:$0xff]  ;;  %v1141_v2 = vld [vmem:[%s2180_s1 + $0xa0] sm:$0xff] }
   0x2   :  { %1404 = vmatprep.subr.mxu0 %v1142_v0  ;;  %1432 = vmatprep.subr.mxu1 %v28_v1  ;;  %v27_v3 = vld [vmem:[%s2180_s1 + $0x48] sm:$0xff]  ;;  %v1140_v4 = vld [vmem:[%s2180_s1 + $0x98] sm:$0xff]  ;;  %v26_v5 = vld [vmem:[%s2180_s1 + $0x40] sm:$0xff] }
   0x3   :  { %1405 = vmatpush3.msra.mxu0 %v1142_v0  ;;  %1433 = vmatpush3.msra.mxu1 %v28_v1  ;;  %v1139_v6 = vld [vmem:[%s2180_s1 + $0x90] sm:$0xff]  ;;  %v25_v7 = vld [vmem:[%s2180_s1 + $0x38] sm:$0xff]  ;;  %v1138_v8 = vld [vmem:[%s2180_s1 + $0x88] sm:$0xff] }
   0x4   :  { %1406 = vmatprep.subr.mxu0 %v1141_v2  ;;  %1434 = vmatprep.subr.mxu1 %v27_v3  ;;  %v24_v9 = vld [vmem:[%s2180_s1 + $0x30] sm:$0xff]  ;;  %v1137_v10 = vld [vmem:[%s2180_s1 + $0x80] sm:$0xff]  ;;  %v23_v11 = vld [vmem:[%s2180_s1 + $0x28] sm:$0xff] }
   0x5   :  { %1407 = vmatpush3.msra.mxu0 %v1141_v2  ;;  %1435 = vmatpush3.msra.mxu1 %v27_v3  ;;  %v1136_v12 = vld [vmem:[%s2180_s1 + $0x78] sm:$0xff]  ;;  %v22_v13 = vld [vmem:[%s2180_s1 + $0x20] sm:$0xff]  ;;  %v1135_v14 = vld [vmem:[%s2180_s1 + $0x70] sm:$0xff] }
   0x6   :  { %1408 = vmatprep.subr.mxu0 %v1140_v4  ;;  %1436 = vmatprep.subr.mxu1 %v26_v5  ;;  %v21_v15 = vld [vmem:[%s2180_s1 + $0x18] sm:$0xff]  ;;  %v1134_v16 = vld [vmem:[%s2180_s1 + $0x68] sm:$0xff]  ;;  %v20_v17 = vld [vmem:[%s2180_s1 + $0x10] sm:$0xff] }
   0x7   :  { %1409 = vmatpush3.msra.mxu0 %v1140_v4  ;;  %1437 = vmatpush3.msra.mxu1 %v26_v5  ;;  %v1133_v18 = vld [vmem:[%s2180_s1 + $0x60] sm:$0xff]  ;;  %v19_v19 = vld [vmem:[%s2180_s1 + $0x8] sm:$0xff]  ;;  %v1132_v20 = vld [vmem:[%s2180_s1 + $0x58] sm:$0xff] }
   0x8   :  { %1410 = vmatprep.subr.mxu0 %v1139_v6  ;;  %1438 = vmatprep.subr.mxu1 %v25_v7  ;;  %v18_v21 = vld [vmem:[%s2180_s1] sm:$0xff]  ;;  %v1775_v24 = vld [vmem:[%s2181_s0 + $0xb] sm:$0xff]  ;;  %v1160_v28 = vld [vmem:[%s2180_s1 + $0xf8] sm:$0xff] }
   0x9   :  { %1411 = vmatpush3.msra.mxu0 %v1139_v6  ;;  %1439 = vmatpush3.msra.mxu1 %v25_v7  ;;  %v1767_v22 = vld [vmem:[%s2181_s0 + $0x3] sm:$0xff]  ;;  %v1188_v27 = vld [vmem:[%s2180_s1 + $0x1b0] sm:$0xff]  ;;  %v1185_v33 = vld [vmem:[%s2180_s1 + $0x198] sm:$0xff] }
   0xa   :  { %1412 = vmatprep.subr.mxu0 %v1138_v8  ;;  %1440 = vmatprep.subr.mxu1 %v24_v9  ;;  %v14_v23 = vld [vmem:[%s2181_s0 + $0x2] sm:$0xff]  ;;  %v15_v25 = vld [vmem:[%s2181_s0 + $0xa] sm:$0xff]  ;;  %v1156_v36 = vld [vmem:[%s2180_s1 + $0xd8] sm:$0xff] }
   0xb   :  { %1413 = vmatpush3.msra.mxu0 %v1138_v8  ;;  %1441 = vmatpush3.msra.mxu1 %v24_v9  ;;  %v1161_v26 = vld [vmem:[%s2180_s1 + $0x100] sm:$0xff]  ;;  %v1187_v29 = vld [vmem:[%s2180_s1 + $0x1a8] sm:$0xff]  ;;  %v1159_v30 = vld [vmem:[%s2180_s1 + $0xf0] sm:$0xff] }
   0xc   :  { %1414 = vmatprep.subr.mxu0 %v1137_v10  ;;  %1442 = vmatprep.subr.mxu1 %v23_v11  ;;  %v1186_v31 = vld [vmem:[%s2180_s1 + $0x1a0] sm:$0xff]  ;;  %v1158_v32 = vld [vmem:[%s2180_s1 + $0xe8] sm:$0xff]  ;;  %v1184_v35 = vld [vmem:[%s2180_s1 + $0x190] sm:$0xff] }
   0xd   :  { %1415 = vmatpush3.msra.mxu0 %v1137_v10  ;;  %1443 = vmatpush3.msra.mxu1 %v23_v11  ;;  %v1157_v34 = vld [vmem:[%s2180_s1 + $0xe0] sm:$0xff]  ;;  %v1183_v37 = vld [vmem:[%s2180_s1 + $0x188] sm:$0xff]  ;;  %v1155_v38 = vld [vmem:[%s2180_s1 + $0xd0] sm:$0xff] }
   0xe   :  { %1416 = vmatprep.subr.mxu0 %v1136_v12  ;;  %1444 = vmatprep.subr.mxu1 %v22_v13  ;;  %v1182_v39 = vld [vmem:[%s2180_s1 + $0x180] sm:$0xff]  ;;  %v1154_v40 = vld [vmem:[%s2180_s1 + $0xc8] sm:$0xff]  ;;  %v1181_v41 = vld [vmem:[%s2180_s1 + $0x178] sm:$0xff] }
   0xf   :  { %1417 = vmatpush3.msra.mxu0 %v1136_v12  ;;  %1445 = vmatpush3.msra.mxu1 %v22_v13  ;;  %v1837_v42 = vld [vmem:[%s2181_s0 + $0x1b] sm:$0xff]  ;;  %v1180_v45 = vld [vmem:[%s2180_s1 + $0x170] sm:$0xff]  ;;  %v1851_v46 = vld [vmem:[%s2181_s0 + $0x23] sm:$0xff] }
  0x10   :  { %1418 = vmatprep.subr.mxu0 %v1135_v14  ;;  %1446 = vmatprep.subr.mxu1 %v21_v15  ;;  %v16_v43 = vld [vmem:[%s2181_s0 + $0x1a] sm:$0xff]  ;;  %v17_v47 = vld [vmem:[%s2181_s0 + $0x22] sm:$0xff]  ;;  %v1151_v50 = vld [vmem:[%s2180_s1 + $0xb0] sm:$0xff] }
  0x11   :  { %1419 = vmatpush3.msra.mxu0 %v1135_v14  ;;  %1447 = vmatpush3.msra.mxu1 %v21_v15  ;;  %v1153_v44 = vld [vmem:[%s2180_s1 + $0xc0] sm:$0xff]  ;;  %v1152_v48 = vld [vmem:[%s2180_s1 + $0xb8] sm:$0xff]  ;;  %v1179_v49 = vld [vmem:[%s2180_s1 + $0x168] sm:$0xff] }
  0x12   :  { %1420 = vmatprep.subr.mxu0 %v1134_v16  ;;  %1448 = vmatprep.subr.mxu1 %v20_v17  ;;  %v1178_v51 = vld [vmem:[%s2180_s1 + $0x160] sm:$0xff]  ;;  %v241_v53 = vld [vmem:[%s2181_s0 + $0xc] sm:$0xff]  ;;  %v1177_v54 = vld [vmem:[%s2180_s1 + $0x158] sm:$0xff] }
  0x13   :  { %1421 = vmatpush3.msra.mxu0 %v1134_v16  ;;  %1449 = vmatpush3.msra.mxu1 %v20_v17  ;;  %v240_v52 = vld [vmem:[%s2181_s0 + $0x4] sm:$0xff]  ;;  %v1176_v56 = vld [vmem:[%s2180_s1 + $0x150] sm:$0xff]  ;;  %v242_v58 = vld [vmem:[%s2181_s0 + $0x1c] sm:$0xff] }
  0x14   :  { %1422 = vmatprep.subr.mxu0 %v1133_v18  ;;  %1450 = vmatprep.subr.mxu1 %v19_v19  ;;  %v1207_v55 = vld [vmem:[%s2180_s1 + $0x208] sm:$0xff]  ;;  %v1206_v57 = vld [vmem:[%s2180_s1 + $0x200] sm:$0xff]  ;;  %v1205_v61 = vld [vmem:[%s2180_s1 + $0x1f8] sm:$0xff] }
  0x15   :  { %1423 = vmatpush3.msra.mxu0 %v1133_v18  ;;  %1451 = vmatpush3.msra.mxu1 %v19_v19  ;;  %v243_v59 = vld [vmem:[%s2181_s0 + $0x24] sm:$0xff]  ;;  %v1204_v63 = vld [vmem:[%s2180_s1 + $0x1f0] sm:$0xff]  ;;  %v1173_v0 = vld [vmem:[%s2180_s1 + $0x138] sm:$0xff] }
  0x16   :  { %1424 = vmatprep.subr.mxu0 %v1132_v20  ;;  %1452 = vmatprep.subr.mxu1 %v18_v21  ;;  %v1175_v60 = vld [vmem:[%s2180_s1 + $0x148] sm:$0xff]  ;;  %v1174_v62 = vld [vmem:[%s2180_s1 + $0x140] sm:$0xff]  ;;  %v1172_v2 = vld [vmem:[%s2180_s1 + $0x130] sm:$0xff] }
  0x17   :  { %1425 = vmatpush3.msra.mxu0 %v1132_v20  ;;  %1426 = vmatprep.mubr.msk.f32.mxu0 %vm45_vm0, %v1767_v22  ;;  %v1203_v1 = vld [vmem:[%s2180_s1 + $0x1e8] sm:$0xff]  ;;  %v1202_v3 = vld [vmem:[%s2180_s1 + $0x1e0] sm:$0xff]  ;;  %v1201_v5 = vld [vmem:[%s2180_s1 + $0x1d8] sm:$0xff] }
  0x18   :  { %1453 = vmatpush3.msra.mxu1 %v18_v21  ;;  %1454 = vmatprep.mubr.msk.f32.mxu1 %vm45_vm0, %v14_v23  ;;  %v1171_v4 = vld [vmem:[%s2180_s1 + $0x128] sm:$0xff]  ;;  %v1170_v6 = vld [vmem:[%s2180_s1 + $0x120] sm:$0xff]  ;;  %v1200_v7 = vld [vmem:[%s2180_s1 + $0x1d0] sm:$0xff] }
  0x19   :  { %1427 = vmatmul.mubr.msk.f32.vlgmr.msra.gmra.mxu0 %vm45_vm0, %v1775_v24  ;;  %1455 = vmatmul.mubr.msk.f32.vlgmr.msra.gmra.mxu1 %vm45_vm0, %v15_v25  ;;  %v1169_v8 = vld [vmem:[%s2180_s1 + $0x118] sm:$0xff]  ;;  %v1199_v9 = vld [vmem:[%s2180_s1 + $0x1c8] sm:$0xff]  ;;  %v1168_v10 = vld [vmem:[%s2180_s1 + $0x110] sm:$0xff] }
  0x1a   :  { %1460 = vmatprep.subr.mxu0 %v1161_v26  ;;  %1488 = vmatprep.subr.mxu1 %v1188_v27  ;;  %v1198_v11 = vld [vmem:[%s2180_s1 + $0x1c0] sm:$0xff]  ;;  %v1167_v12 = vld [vmem:[%s2180_s1 + $0x108] sm:$0xff]  ;;  %v1197_v13 = vld [vmem:[%s2180_s1 + $0x1b8] sm:$0xff] }
  0x1b   :  { %1461 = vmatpush3.msra.mxu0 %v1161_v26  ;;  %1489 = vmatpush3.msra.mxu1 %v1188_v27  ;;  %v384_v14 = vld [vmem:[%s2181_s0 + $0x1] sm:$0xff]  ;;  %v385_v16 = vld [vmem:[%s2181_s0 + $0x9] sm:$0xff]  ;;  %v1239_v18 = vld [vmem:[%s2180_s1 + $0x2b8] sm:$0xff] }
  0x1c   :  { %1462 = vmatprep.subr.mxu0 %v1160_v28  ;;  %1490 = vmatprep.subr.mxu1 %v1187_v29  ;;  %v610_v15 = vld [vmem:[%s2181_s0 + $0x5] sm:$0xff]  ;;  %v611_v17 = vld [vmem:[%s2181_s0 + $0xd] sm:$0xff]  ;;  %v1227_v21 = vld [vmem:[%s2180_s1 + $0x258] sm:$0xff] }
  0x1d   :  { %1463 = vmatpush3.msra.mxu0 %v1160_v28  ;;  %1491 = vmatpush3.msra.mxu1 %v1187_v29  ;;  %v1228_v19 = vld [vmem:[%s2180_s1 + $0x260] sm:$0xff]  ;;  %v1238_v20 = vld [vmem:[%s2180_s1 + $0x2b0] sm:$0xff]  ;;  %v1237_v26 = vld [vmem:[%s2180_s1 + $0x2a8] sm:$0xff] }
  0x1e   :  { %1464 = vmatprep.subr.mxu0 %v1159_v30  ;;  %1492 = vmatprep.subr.mxu1 %v1186_v31  ;;  %v386_v23 = vld [vmem:[%s2181_s0 + $0x19] sm:$0xff]  ;;  %v387_v25 = vld [vmem:[%s2181_s0 + $0x21] sm:$0xff]  ;;  %v1226_v27 = vld [vmem:[%s2180_s1 + $0x250] sm:$0xff] }
  0x1f   :  { %1465 = vmatpush3.msra.mxu0 %v1159_v30  ;;  %1493 = vmatpush3.msra.mxu1 %v1186_v31  ;;  %v612_v28 = vld [vmem:[%s2181_s0 + $0x1d] sm:$0xff]  ;;  %v613_v30 = vld [vmem:[%s2181_s0 + $0x25] sm:$0xff] }
  0x20   :  { %1466 = vmatprep.subr.mxu0 %v1158_v32  ;;  %1494 = vmatprep.subr.mxu1 %v1185_v33  ;;  %v1236_v29 = vld [vmem:[%s2180_s1 + $0x2a0] sm:$0xff]  ;;  %v1225_v31 = vld [vmem:[%s2180_s1 + $0x248] sm:$0xff] }
  0x21   :  { %1467 = vmatpush3.msra.mxu0 %v1158_v32  ;;  %1495 = vmatpush3.msra.mxu1 %v1185_v33  ;;  %v1235_v32 = vld [vmem:[%s2180_s1 + $0x298] sm:$0xff]  ;;  %v1224_v33 = vld [vmem:[%s2180_s1 + $0x240] sm:$0xff] }
  0x22   :  { %1468 = vmatprep.subr.mxu0 %v1157_v34  ;;  %1496 = vmatprep.subr.mxu1 %v1184_v35 }
  0x23   :  { %1469 = vmatpush3.msra.mxu0 %v1157_v34  ;;  %1497 = vmatpush3.msra.mxu1 %v1184_v35  ;;  %v1234_v34 = vld [vmem:[%s2180_s1 + $0x290] sm:$0xff]  ;;  %v1223_v35 = vld [vmem:[%s2180_s1 + $0x238] sm:$0xff] }
  0x24   :  { %1470 = vmatprep.subr.mxu0 %v1156_v36  ;;  %1498 = vmatprep.subr.mxu1 %v1183_v37 }
  0x25   :  { %1471 = vmatpush3.msra.mxu0 %v1156_v36  ;;  %1499 = vmatpush3.msra.mxu1 %v1183_v37  ;;  %v1233_v36 = vld [vmem:[%s2180_s1 + $0x288] sm:$0xff]  ;;  %v1222_v37 = vld [vmem:[%s2180_s1 + $0x230] sm:$0xff] }
  0x26   :  { %1472 = vmatprep.subr.mxu0 %v1155_v38  ;;  %1500 = vmatprep.subr.mxu1 %v1182_v39 }
  0x27   :  { %1473 = vmatpush3.msra.mxu0 %v1155_v38  ;;  %1501 = vmatpush3.msra.mxu1 %v1182_v39  ;;  %v1232_v38 = vld [vmem:[%s2180_s1 + $0x280] sm:$0xff]  ;;  %v1221_v39 = vld [vmem:[%s2180_s1 + $0x228] sm:$0xff] }
  0x28   :  { %1474 = vmatprep.subr.mxu0 %v1154_v40  ;;  %1502 = vmatprep.subr.mxu1 %v1181_v41 }
  0x29   :  { %1475 = vmatpush3.msra.mxu0 %v1154_v40  ;;  %1503 = vmatpush3.msra.mxu1 %v1181_v41  ;;  %v1231_v40 = vld [vmem:[%s2180_s1 + $0x278] sm:$0xff]  ;;  %v1220_v41 = vld [vmem:[%s2180_s1 + $0x220] sm:$0xff] }
  0x2a   :  { %1429 = vmatprep.mubr.msk.f32.mxu0 %vm45_vm0, %v1837_v42  ;;  %1457 = vmatprep.mubr.msk.f32.mxu1 %vm45_vm0, %v16_v43  ;;  %v1230_v43 = vld [vmem:[%s2180_s1 + $0x270] sm:$0xff] }
  0x2b   :  { %1476 = vmatprep.subr.mxu0 %v1153_v44  ;;  %1504 = vmatprep.subr.mxu1 %v1180_v45 }
  0x2c   :  { %1430 = vmatmul.mubr.msk.f32.gmra.mxu0 %vm45_vm0, %v1851_v46  ;;  %1458 = vmatmul.mubr.msk.f32.gmra.mxu1 %vm45_vm0, %v17_v47  ;;  %v1218_v47 = vld [vmem:[%s2180_s1 + $0x210] sm:$0xff] }
  0x2d   :  { %1477 = vmatpush3.msra.mxu0 %v1153_v44  ;;  %1505 = vmatpush3.msra.mxu1 %v1180_v45  ;;  %v1219_v44 = vld [vmem:[%s2180_s1 + $0x218] sm:$0xff]  ;;  %v1229_v45 = vld [vmem:[%s2180_s1 + $0x268] sm:$0xff] }
  0x2e   :  { %1478 = vmatprep.subr.mxu0 %v1152_v48  ;;  %1506 = vmatprep.subr.mxu1 %v1179_v49 }
  0x2f   :  { %1479 = vmatpush3.msra.mxu0 %v1152_v48  ;;  %1507 = vmatpush3.msra.mxu1 %v1179_v49  ;;  %v756_v48 = vld [vmem:[%s2181_s0] sm:$0xff]  ;;  %v757_v49 = vld [vmem:[%s2181_s0 + $0x8] sm:$0xff] }
  0x30   :  { %1480 = vmatprep.subr.mxu0 %v1151_v50  ;;  %1508 = vmatprep.subr.mxu1 %v1178_v51 }
  0x31   :  { %1481 = vmatpush3.msra.mxu0 %v1151_v50  ;;  %1482 = vmatprep.mubr.msk.f32.mxu0 %vm45_vm0, %v240_v52  ;;  %v1258_v50 = vld [vmem:[%s2180_s1 + $0x310] sm:$0xff] }
  0x32   :  { %1509 = vmatpush3.msra.mxu1 %v1178_v51  ;;  %1510 = vmatprep.mubr.msk.f32.mxu1 %vm45_vm0, %v1767_v22  ;;  %v1257_v51 = vld [vmem:[%s2180_s1 + $0x308] sm:$0xff]  ;;  %v1254_v52 = vld [vmem:[%s2180_s1 + $0x2f0] sm:$0xff] }
  0x33   :  { %1483 = vmatmul.mubr.msk.f32.vlgmr.msra.gmra.mxu0 %vm45_vm0, %v241_v53  ;;  %1511 = vmatmul.mubr.msk.f32.vlgmr.msra.gmra.mxu1 %vm45_vm0, %v1775_v24  ;;  %v1253_v53 = vld [vmem:[%s2180_s1 + $0x2e8] sm:$0xff] }
  0x34   :  { %1516 = vmatprep.subr.mxu0 %v1177_v54  ;;  %1544 = vmatprep.subr.mxu1 %v1207_v55 }
  0x35   :  { %1517 = vmatpush3.msra.mxu0 %v1177_v54  ;;  %1545 = vmatpush3.msra.mxu1 %v1207_v55  ;;  %v1252_v54 = vld [vmem:[%s2180_s1 + $0x2e0] sm:$0xff]  ;;  %v1251_v55 = vld [vmem:[%s2180_s1 + $0x2d8] sm:$0xff] }
  0x36   :  { %1518 = vmatprep.subr.mxu0 %v1176_v56  ;;  %1546 = vmatprep.subr.mxu1 %v1206_v57 }
  0x37   :  { %1485 = vmatprep.mubr.msk.f32.mxu0 %vm45_vm0, %v242_v58  ;;  %1519 = vmatpush3.msra.mxu0 %v1176_v56  ;;  %v758_v56 = vld [vmem:[%s2181_s0 + $0x18] sm:$0xff]  ;;  %v1250_v58 = vld [vmem:[%s2180_s1 + $0x2d0] sm:$0xff] }
  0x38   :  { %1547 = vmatpush3.msra.mxu1 %v1206_v57  ;;  %1486 = vmatmul.mubr.msk.f32.gmra.mxu0 %vm45_vm0, %v243_v59  ;;  %v759_v57 = vld [vmem:[%s2181_s0 + $0x20] sm:$0xff]  ;;  %v1249_v59 = vld [vmem:[%s2180_s1 + $0x2c8] sm:$0xff] }
  0x39   :  { %1520 = vmatprep.subr.mxu0 %v1175_v60  ;;  %1548 = vmatprep.subr.mxu1 %v1205_v61 }
  0x3a   :  { %1521 = vmatpush3.msra.mxu0 %v1175_v60  ;;  %1549 = vmatpush3.msra.mxu1 %v1205_v61  ;;  %v984_v60 = vld [vmem:[%s2181_s0 + $0x1e] sm:$0xff]  ;;  %v983_v61 = vld [vmem:[%s2181_s0 + $0xe] sm:$0xff] }
  0x3b   :  { %1522 = vmatprep.subr.mxu0 %v1174_v62  ;;  %1550 = vmatprep.subr.mxu1 %v1204_v63 }
  0x3c   :  { %1523 = vmatpush3.msra.mxu0 %v1174_v62  ;;  %1551 = vmatpush3.msra.mxu1 %v1204_v63  ;;  %v985_v62 = vld [vmem:[%s2181_s0 + $0x26] sm:$0xff] }
  0x3d   :  { %1524 = vmatprep.subr.mxu0 %v1173_v0  ;;  %1552 = vmatprep.subr.mxu1 %v1203_v1 }
  0x3e   :  { %1525 = vmatpush3.msra.mxu0 %v1173_v0  ;;  %1553 = vmatpush3.msra.mxu1 %v1203_v1 }
  0x3f   :  { %1526 = vmatprep.subr.mxu0 %v1172_v2  ;;  %1554 = vmatprep.subr.mxu1 %v1202_v3 }
  0x40   :  { %1527 = vmatpush3.msra.mxu0 %v1172_v2  ;;  %1555 = vmatpush3.msra.mxu1 %v1202_v3 }
  0x41   :  { %1528 = vmatprep.subr.mxu0 %v1171_v4  ;;  %1556 = vmatprep.subr.mxu1 %v1201_v5 }
  0x42   :  { %1529 = vmatpush3.msra.mxu0 %v1171_v4  ;;  %1557 = vmatpush3.msra.mxu1 %v1201_v5 }
  0x43   :  { %1530 = vmatprep.subr.mxu0 %v1170_v6  ;;  %1558 = vmatprep.subr.mxu1 %v1200_v7 }
  0x44   :  { %1531 = vmatpush3.msra.mxu0 %v1170_v6  ;;  %1559 = vmatpush3.msra.mxu1 %v1200_v7 }
  0x45   :  { %1513 = vmatprep.mubr.msk.f32.mxu1 %vm45_vm0, %v1837_v42  ;;  %1532 = vmatprep.subr.mxu0 %v1169_v8 }
  0x46   :  { %1560 = vmatprep.subr.mxu1 %v1199_v9  ;;  %1514 = vmatmul.mubr.msk.f32.gmra.mxu1 %vm45_vm0, %v1851_v46 }
  0x47   :  { %1533 = vmatpush3.msra.mxu0 %v1169_v8  ;;  %1561 = vmatpush3.msra.mxu1 %v1199_v9  ;;  %v1166_v8 = vld [vmem:[%s2182_s2] ss:$0 sm:$0xff] }
  0x48   :  { %1534 = vmatprep.subr.mxu0 %v1168_v10  ;;  %1562 = vmatprep.subr.mxu1 %v1198_v11 }
  0x49   :  { %1535 = vmatpush3.msra.mxu0 %v1168_v10  ;;  %1563 = vmatpush3.msra.mxu1 %v1198_v11 }
  0x4a   :  { %1536 = vmatprep.subr.mxu0 %v1167_v12  ;;  %1564 = vmatprep.subr.mxu1 %v1197_v13 }
  0x4b   :  { %1537 = vmatpush3.msra.mxu0 %v1167_v12  ;;  %1538 = vmatprep.mubr.msk.f32.mxu0 %vm45_vm0, %v384_v14 }
  0x4c   :  { %1565 = vmatpush3.msra.mxu1 %v1197_v13  ;;  %1566 = vmatprep.mubr.msk.f32.mxu1 %vm45_vm0, %v610_v15 }
  0x4d   :  { %1539 = vmatmul.mubr.msk.f32.vlgmr.msra.gmra.mxu0 %vm45_vm0, %v385_v16  ;;  %1567 = vmatmul.mubr.msk.f32.vlgmr.msra.gmra.mxu1 %vm45_vm0, %v611_v17 }
  0x4e   :  { %1572 = vmatprep.subr.mxu0 %v1239_v18  ;;  %1600 = vmatprep.subr.mxu1 %v1228_v19 }
  0x4f   :  { %1573 = vmatpush3.msra.mxu0 %v1239_v18  ;;  %1601 = vmatpush3.msra.mxu1 %v1228_v19 }
  0x50   :  { %1574 = vmatprep.subr.mxu0 %v1238_v20  ;;  %1602 = vmatprep.subr.mxu1 %v1227_v21 }
  0x51   :  { %1541 = vmatprep.mubr.msk.f32.mxu0 %vm45_vm0, %v386_v23  ;;  %1575 = vmatpush3.msra.mxu0 %v1238_v20 }
  0x52   :  { %1603 = vmatpush3.msra.mxu1 %v1227_v21  ;;  %1542 = vmatmul.mubr.msk.f32.gmra.mxu0 %vm45_vm0, %v387_v25 }
  0x53   :  { %1576 = vmatprep.subr.mxu0 %v1237_v26  ;;  %1604 = vmatprep.subr.mxu1 %v1226_v27 }
  0x54   :  { %1569 = vmatprep.mubr.msk.f32.mxu1 %vm45_vm0, %v612_v28  ;;  %1577 = vmatpush3.msra.mxu0 %v1237_v26 }
  0x55   :  { %1605 = vmatpush3.msra.mxu1 %v1226_v27  ;;  %1578 = vmatprep.subr.mxu0 %v1236_v29 }
  0x56   :  { %1570 = vmatmul.mubr.msk.f32.gmra.mxu1 %vm45_vm0, %v613_v30  ;;  %1606 = vmatprep.subr.mxu1 %v1225_v31 }
  0x57   :  { %1579 = vmatpush3.msra.mxu0 %v1236_v29  ;;  %1607 = vmatpush3.msra.mxu1 %v1225_v31 }
  0x58   :  { %1580 = vmatprep.subr.mxu0 %v1235_v32  ;;  %1608 = vmatprep.subr.mxu1 %v1224_v33 }
  0x59   :  { %1581 = vmatpush3.msra.mxu0 %v1235_v32  ;;  %1609 = vmatpush3.msra.mxu1 %v1224_v33 }
  0x5a   :  { %1582 = vmatprep.subr.mxu0 %v1234_v34  ;;  %1610 = vmatprep.subr.mxu1 %v1223_v35 }
  0x5b   :  { %1583 = vmatpush3.msra.mxu0 %v1234_v34  ;;  %1611 = vmatpush3.msra.mxu1 %v1223_v35 }
  0x5c   :  { %1584 = vmatprep.subr.mxu0 %v1233_v36  ;;  %1612 = vmatprep.subr.mxu1 %v1222_v37 }
  0x5d   :  { %1585 = vmatpush3.msra.mxu0 %v1233_v36  ;;  %1613 = vmatpush3.msra.mxu1 %v1222_v37 }
  0x5e   :  { %1586 = vmatprep.subr.mxu0 %v1232_v38  ;;  %1614 = vmatprep.subr.mxu1 %v1221_v39 }
  0x5f   :  { %1587 = vmatpush3.msra.mxu0 %v1232_v38  ;;  %1615 = vmatpush3.msra.mxu1 %v1221_v39 }
  0x60   :  { %1588 = vmatprep.subr.mxu0 %v1231_v40  ;;  %1616 = vmatprep.subr.mxu1 %v1220_v41 }
  0x61   :  { %1589 = vmatpush3.msra.mxu0 %v1231_v40  ;;  %1617 = vmatpush3.msra.mxu1 %v1220_v41  ;;  %v1213_v41 = vld [vmem:[%s2182_s2 + $0x1] ss:$0 sm:$0xff] }
  0x62   :  { %1590 = vmatprep.subr.mxu0 %v1230_v43  ;;  %1618 = vmatprep.subr.mxu1 %v1219_v44 }
  0x63   :  { %1591 = vmatpush3.msra.mxu0 %v1230_v43  ;;  %1619 = vmatpush3.msra.mxu1 %v1219_v44 }
  0x64   :  { %1592 = vmatprep.subr.mxu0 %v1229_v45  ;;  %1620 = vmatprep.subr.mxu1 %v1218_v47 }
  0x65   :  { %1593 = vmatpush3.msra.mxu0 %v1229_v45  ;;  %1594 = vmatprep.mubr.msk.f32.mxu0 %vm45_vm0, %v1767_v22  ;;  %v1256_v22 = vld [vmem:[%s2180_s1 + $0x300] sm:$0xff] }
  0x66   :  { %1621 = vmatpush3.msra.mxu1 %v1218_v47  ;;  %1622 = vmatprep.mubr.msk.f32.mxu1 %vm45_vm0, %v756_v48 }
  0x67   :  { %1595 = vmatmul.mubr.msk.f32.vlgmr.msra.gmra.mxu0 %vm45_vm0, %v1775_v24  ;;  %1623 = vmatmul.mubr.msk.f32.vlgmr.msra.gmra.mxu1 %vm45_vm0, %v757_v49  ;;  %v1255_v24 = vld [vmem:[%s2180_s1 + $0x2f8] sm:$0xff] }
  0x68   :  { %1628 = vmatprep.subr.mxu0 %v1258_v50  ;;  %1656 = vmatprep.subr.mxu1 %v1258_v50 }
  0x69   :  { %1629 = vmatpush3.msra.mxu0 %v1258_v50  ;;  %1667 = vmatpush3.msra.mxu1 %v1258_v50 }
  0x6a   :  { %1630 = vmatprep.subr.mxu0 %v1257_v51  ;;  %1657 = vmatprep.subr.mxu1 %v1257_v51 }
  0x6b   :  { %1631 = vmatpush3.msra.mxu0 %v1257_v51  ;;  %1668 = vmatpush3.msra.mxu1 %v1257_v51 }
  0x6c   :  { %1632 = vmatprep.subr.mxu0 %v1256_v22  ;;  %1658 = vmatprep.subr.mxu1 %v1256_v22 }
  0x6d   :  { %1633 = vmatpush3.msra.mxu0 %v1256_v22  ;;  %1669 = vmatpush3.msra.mxu1 %v1256_v22 }
  0x6e   :  { %1634 = vmatprep.subr.mxu0 %v1255_v24  ;;  %1659 = vmatprep.subr.mxu1 %v1255_v24 }
  0x6f   :  { %1635 = vmatpush3.msra.mxu0 %v1255_v24  ;;  %1670 = vmatpush3.msra.mxu1 %v1255_v24 }
  0x70   :  { %1636 = vmatprep.subr.mxu0 %v1254_v52  ;;  %1660 = vmatprep.subr.mxu1 %v1254_v52 }
  0x71   :  { %1637 = vmatpush3.msra.mxu0 %v1254_v52  ;;  %1671 = vmatpush3.msra.mxu1 %v1254_v52 }
  0x72   :  { %1638 = vmatprep.subr.mxu0 %v1253_v53  ;;  %1661 = vmatprep.subr.mxu1 %v1253_v53 }
  0x73   :  { %1639 = vmatpush3.msra.mxu0 %v1253_v53  ;;  %1672 = vmatpush3.msra.mxu1 %v1253_v53 }
  0x74   :  { %1640 = vmatprep.subr.mxu0 %v1252_v54  ;;  %1662 = vmatprep.subr.mxu1 %v1252_v54 }
  0x75   :  { %1641 = vmatpush3.msra.mxu0 %v1252_v54  ;;  %1673 = vmatpush3.msra.mxu1 %v1252_v54 }
  0x76   :  { %1642 = vmatprep.subr.mxu0 %v1251_v55  ;;  %1663 = vmatprep.subr.mxu1 %v1251_v55 }
  0x77   :  { %1597 = vmatprep.mubr.msk.f32.mxu0 %vm45_vm0, %v1837_v42  ;;  %1625 = vmatprep.mubr.msk.f32.mxu1 %vm45_vm0, %v758_v56  ;;  %v1248_v42 = vld [vmem:[%s2180_s1 + $0x2c0] sm:$0xff] }
  0x78   :  { %1643 = vmatpush3.msra.mxu0 %v1251_v55  ;;  %1674 = vmatpush3.msra.mxu1 %v1251_v55 }
  0x79   :  { %1598 = vmatmul.mubr.msk.f32.gmra.mxu0 %vm45_vm0, %v1851_v46  ;;  %1626 = vmatmul.mubr.msk.f32.gmra.mxu1 %vm45_vm0, %v759_v57  ;;  %v982_v46 = vld [vmem:[%s2181_s0 + $0x6] sm:$0xff] }
  0x7a   :  { %1644 = vmatprep.subr.mxu0 %v1250_v58  ;;  %1664 = vmatprep.subr.mxu1 %v1250_v58 }
  0x7b   :  { %1645 = vmatpush3.msra.mxu0 %v1250_v58  ;;  %1675 = vmatpush3.msra.mxu1 %v1250_v58 }
  0x7c   :  { %1646 = vmatprep.subr.mxu0 %v1249_v59  ;;  %1665 = vmatprep.subr.mxu1 %v1249_v59 }
  0x7d   :  { %1647 = vmatpush3.msra.mxu0 %v1249_v59  ;;  %1676 = vmatpush3.msra.mxu1 %v1249_v59 }
  0x7e   :  { %1648 = vmatprep.subr.mxu0 %v1248_v42  ;;  %1666 = vmatprep.subr.mxu1 %v1248_v42 }
  0x7f   :  { %1649 = vmatpush3.msra.mxu0 %v1248_v42  ;;  %1677 = vmatpush3.msra.mxu1 %v1248_v42 }
  0x80   :  { %1650 = vmatprep.mubr.msk.f32.mxu0 %vm45_vm0, %v982_v46  ;;  %1653 = vmatprep.mubr.msk.f32.mxu1 %vm45_vm0, %v984_v60 }
  0x81   :  { %1651 = vmatmul.mubr.msk.f32.vlgmr.msra.gmra.mxu0 %vm45_vm0, %v983_v61  ;;  %1654 = vmatmul.mubr.msk.f32.vlgmr.msra.gmra.mxu1 %vm45_vm0, %v985_v62 }
  0xd9   :  { %v1428_v63 = vpop.f32.mrf.mxu0  ;;  %v1456_v1 = vpop.f32.mrf.mxu1 }
  0xda   :  { %v227_v5 = vadd.f32 %v1456_v1, %v1428_v63 }
  0xdb   :  { %v124_v0 = vpop.f32.mrf.mxu0  ;;  %v221_v4 = vpop.f32.mrf.mxu1 }
  0xdc   :  { %v222_v9 = vadd.f32 %v221_v4, %v124_v0 }
  0xec   :  { %v1431_v2 = vpop.f32.mrf.mxu0  ;;  %v1459_v6 = vpop.f32.mrf.mxu1 }
  0xed   :  { %v237_v15 = vadd.f32 %v1459_v6, %v1431_v2 }
  0xee   :  { %v134_v3 = vpop.f32.mrf.mxu0  ;;  %v231_v12 = vpop.f32.mrf.mxu1 }
  0xef   :  { %v232_v19 = vadd.f32 %v231_v12, %v134_v3  ;;  %v1264_v12 = vld [vmem:[%s2182_s2 + $0x2] ss:$0 sm:$0xff] }
  0xf3   :  { %v1484_v7 = vpop.f32.mrf.mxu0  ;;  %v1512_v33 = vpop.f32.mrf.mxu1 }
  0xf4   :  { %v354_v10 = vadd.f32 %v1484_v7, %v227_v5 }
  0xf5   :  { %v334_v11 = vpop.f32.mrf.mxu0  ;;  %v494_v35 = vpop.f32.mrf.mxu1 }
  0xf6   :  { %v365_v13 = vadd.f32 %v1166_v8, %v354_v10  ;;  %v353_v14 = vadd.f32 %v334_v11, %v222_v9 }
  0xf8   :  { %vm369_vm1 = vcmp.ge.f32.partialorder %v365_v13, 0.0  ;;  %v373_v16 = vmul.f32 0.3, %v365_v13  ;;  %v364_v17 = vadd.f32 %v1166_v8, %v353_v14  ;;  %v1487_v18 = vpop.f32.mrf.mxu0 }
  0xf9   :  { %v356_v20 = vadd.f32 %v1487_v18, %v237_v15 }
  0xfa   :  { %v377_v21 = vsel %vm369_vm1, %v365_v13, %v373_v16  ;;  %vm368_vm2 = vcmp.ge.f32.partialorder %v364_v17, 0.0  ;;  %v372_v23 = vmul.f32 0.3, %v364_v17  ;;  %v344_v25 = vpop.f32.mrf.mxu0 }
  0xfb   :  { %381 = vst [vmem:[%s2183_s3 + $0x8] sm:$0xff] %v377_v21  ;;  %v367_v26 = vadd.f32 %v1166_v8, %v356_v20  ;;  %v355_v27 = vadd.f32 %v344_v25, %v232_v19 }
  0xfc   :  { %v376_v28 = vsel %vm368_vm2, %v364_v17, %v372_v23 }
  0xfd   :  { %380 = vst [vmem:[%s2183_s3] sm:$0xff] %v376_v28  ;;  %vm371_vm3 = vcmp.ge.f32.partialorder %v367_v26, 0.0  ;;  %v375_v29 = vmul.f32 0.3, %v367_v26  ;;  %v366_v30 = vadd.f32 %v1166_v8, %v355_v27 }
  0xff   :  { %v379_v31 = vsel %vm371_vm3, %v367_v26, %v375_v29  ;;  %vm370_vm4 = vcmp.ge.f32.partialorder %v366_v30, 0.0  ;;  %v374_v32 = vmul.f32 0.3, %v366_v30 }
 0x100   :  { %383 = vst [vmem:[%s2183_s3 + $0x18] sm:$0xff] %v379_v31 }
 0x101   :  { %v378_v34 = vsel %vm370_vm4, %v366_v30, %v374_v32 }
 0x102   :  { %382 = vst [vmem:[%s2183_s3 + $0x10] sm:$0xff] %v378_v34 }
 0x106   :  { %v1515_v36 = vpop.f32.mrf.mxu1 }
 0x108   :  { %v504_v37 = vpop.f32.mrf.mxu1 }
 0x10d   :  { %v1540_v38 = vpop.f32.mrf.mxu0  ;;  %v1568_v39 = vpop.f32.mrf.mxu1 }
 0x10e   :  { %v597_v40 = vadd.f32 %v1540_v38, %v1512_v33 }
 0x10f   :  { %v591_v43 = vpop.f32.mrf.mxu0  ;;  %v704_v47 = vpop.f32.mrf.mxu1 }
 0x110   :  { %v724_v44 = vadd.f32 %v1568_v39, %v597_v40  ;;  %v592_v45 = vadd.f32 %v591_v43, %v494_v35 }
 0x112   :  { %v736_v48 = vadd.f32 %v1213_v41, %v724_v44  ;;  %v723_v49 = vadd.f32 %v704_v47, %v592_v45  ;;  %v1543_v50 = vpop.f32.mrf.mxu0 }
 0x113   :  { %v607_v51 = vadd.f32 %v1543_v50, %v1515_v36 }
 0x114   :  { %vm740_vm5 = vcmp.ge.f32.partialorder %v736_v48, 0.0  ;;  %v744_v22 = vmul.f32 0.3, %v736_v48  ;;  %v735_v24 = vadd.f32 %v1213_v41, %v723_v49  ;;  %v601_v52 = vpop.f32.mrf.mxu0 }
 0x115   :  { %v602_v53 = vadd.f32 %v601_v52, %v504_v37 }
 0x116   :  { %v748_v54 = vsel %vm740_vm5, %v736_v48, %v744_v22  ;;  %vm739_vm6 = vcmp.ge.f32.partialorder %v735_v24, 0.0  ;;  %v743_v55 = vmul.f32 0.3, %v735_v24  ;;  %v1571_v56 = vpop.f32.mrf.mxu1 }
 0x117   :  { %1215 = vst [vmem:[%s2183_s3 + $0x28] sm:$0xff] %v748_v54  ;;  %v726_v57 = vadd.f32 %v1571_v56, %v607_v51 }
 0x118   :  { %v747_v58 = vsel %vm739_vm6, %v735_v24, %v743_v55  ;;  %v714_v59 = vpop.f32.mrf.mxu1 }
 0x119   :  { %1214 = vst [vmem:[%s2183_s3 + $0x20] sm:$0xff] %v747_v58  ;;  %v738_v42 = vadd.f32 %v1213_v41, %v726_v57  ;;  %v725_v46 = vadd.f32 %v714_v59, %v602_v53 }
 0x11b   :  { %vm742_vm7 = vcmp.ge.f32.partialorder %v738_v42, 0.0  ;;  %v746_v60 = vmul.f32 0.3, %v738_v42  ;;  %v737_v61 = vadd.f32 %v1213_v41, %v725_v46 }
 0x11d   :  { %v750_v62 = vsel %vm742_vm7, %v738_v42, %v746_v60  ;;  %vm741_vm8 = vcmp.ge.f32.partialorder %v737_v61, 0.0  ;;  %v745_v63 = vmul.f32 0.3, %v737_v61 }
 0x11e   :  { %1217 = vst [vmem:[%s2183_s3 + $0x38] sm:$0xff] %v750_v62 }
 0x11f   :  { %v749_v0 = vsel %vm741_vm8, %v737_v61, %v745_v63 }
 0x120   :  { %1216 = vst [vmem:[%s2183_s3 + $0x30] sm:$0xff] %v749_v0 }
 0x127   :  { %v1596_v1 = vpop.f32.mrf.mxu0  ;;  %v1624_v2 = vpop.f32.mrf.mxu1 }
 0x128   :  { %v969_v9 = vadd.f32 %v1624_v2, %v1596_v1 }
 0x129   :  { %v866_v3 = vpop.f32.mrf.mxu0  ;;  %v963_v4 = vpop.f32.mrf.mxu1 }
 0x12a   :  { %v964_v14 = vadd.f32 %v963_v4, %v866_v3 }
 0x139   :  { %v1599_v5 = vpop.f32.mrf.mxu0  ;;  %v1627_v6 = vpop.f32.mrf.mxu1 }
 0x13a   :  { %v979_v10 = vadd.f32 %v1627_v6, %v1599_v5 }
 0x13b   :  { %v876_v7 = vpop.f32.mrf.mxu0  ;;  %v973_v8 = vpop.f32.mrf.mxu1 }
 0x13c   :  { %v974_v15 = vadd.f32 %v973_v8, %v876_v7 }
 0x141   :  { %v1652_v11 = vpop.f32.mrf.mxu0  ;;  %v1655_v13 = vpop.f32.mrf.mxu1 }
 0x142   :  { %v1096_v16 = vadd.f32 %v1652_v11, %v969_v9  ;;  %v1098_v17 = vadd.f32 %v1655_v13, %v979_v10 }
 0x143   :  { %v1076_v18 = vpop.f32.mrf.mxu0  ;;  %v1086_v19 = vpop.f32.mrf.mxu1 }
 0x144   :  { %v1108_v20 = vadd.f32 %v1264_v12, %v1096_v16  ;;  %v1110_v21 = vadd.f32 %v1264_v12, %v1098_v17  ;;  %v1095_v23 = vadd.f32 %v1076_v18, %v964_v14  ;;  %v1097_v25 = vadd.f32 %v1086_v19, %v974_v15 }
 0x146   :  { %vm1112_vm9 = vcmp.ge.f32.partialorder %v1108_v20, 0.0  ;;  %v1116_v26 = vmul.f32 0.3, %v1108_v20  ;;  %vm1114_vm10 = vcmp.ge.f32.partialorder %v1110_v21, 0.0  ;;  %v1118_v27 = vmul.f32 0.3, %v1110_v21 }
 0x147   :  { %v1107_v28 = vadd.f32 %v1264_v12, %v1095_v23  ;;  %v1109_v29 = vadd.f32 %v1264_v12, %v1097_v25 }
 0x148   :  { %v1120_v30 = vsel %vm1112_vm9, %v1108_v20, %v1116_v26  ;;  %v1122_v31 = vsel %vm1114_vm10, %v1110_v21, %v1118_v27 }
 0x149   :  { %1266 = vst [vmem:[%s2183_s3 + $0x48] sm:$0xff] %v1120_v30  ;;  %1268 = vst [vmem:[%s2183_s3 + $0x58] sm:$0xff] %v1122_v31  ;;  %vm1111_vm11 = vcmp.ge.f32.partialorder %v1107_v28, 0.0  ;;  %v1115_v32 = vmul.f32 0.3, %v1107_v28  ;;  %vm1113_vm12 = vcmp.ge.f32.partialorder %v1109_v29, 0.0 }
 0x14a   :  { %v1117_v33 = vmul.f32 0.3, %v1109_v29 }
 0x14b   :  { %v1119_v34 = vsel %vm1111_vm11, %v1107_v28, %v1115_v32 }
 0x14c   :  { %v1121_v35 = vsel %vm1113_vm12, %v1109_v29, %v1117_v33  ;;  %1265 = vst [vmem:[%s2183_s3 + $0x40] sm:$0xff] %v1119_v34 }
 0x14d   :  { %1267 = vst [vmem:[%s2183_s3 + $0x50] sm:$0xff] %v1121_v35 }

</bundles_post_ra>
